<compile_context>
chip_gen: v7x
topology: tpu7x:2x2x1
jax: 0.10.0
libtpu: 0.0.40
codegen_flags: <defaults>
</compile_context>

<pallas_src>
import jax
import jax.numpy as jnp
from jax import lax
from jax.experimental import pallas as pl
from jax.experimental.pallas import tpu as pltpu


_BN_EPS = 1e-5
_LN_EPS = 1e-5
_NEG_SLOPE = 0.2


def _round_up(x, m):
    return (x + m - 1) // m * m


# --------------------------------------------------------------------------
# Kernel
# --------------------------------------------------------------------------
def _make_mifc_kernel(use_ln: bool, n_units: int, n_pad: int):
    """Fused MIFCNet forward kernel (optionally with LayerNorm).

    vec_ref rows: 0 = bias1 (folded BN affine), 1 = b2 + b_sc,
                  2 = ln_gamma, 3 = ln_beta (only when use_ln).
    """
    inv_n = 1.0 / float(n_units)

    def kernel(x_ref, wcat_ref, w2_ref, vec_ref, o_ref):
        x = x_ref[...]                                              # (tb, n_input)

        # One MXU matmul serves both branches that read x: [w1_folded | w_sc].
        xz = jnp.dot(x, wcat_ref[...], preferred_element_type=jnp.float32)
        h1 = xz[:, :n_pad] + vec_ref[0:1, :]                        # BN folded in
        sc = xz[:, n_pad:]                                          # shortcut term
        h1 = jnp.where(h1 >= 0, h1, _NEG_SLOPE * h1)                # LeakyReLU(0.2)

        h = jnp.dot(h1.astype(w2_ref.dtype), w2_ref[...],
                    preferred_element_type=jnp.float32)
        h = h + vec_ref[1:2, :] + sc                                # b2 + b_sc folded

        if use_ln:
            # Padded feature columns are exactly 0 before LN, so sums over the
            # padded width equal sums over the real width; divide by n_units.
            mu = jnp.sum(h, axis=-1, keepdims=True) * inv_n
            ex2 = jnp.sum(h * h, axis=-1, keepdims=True) * inv_n
            var = jnp.maximum(ex2 - mu * mu, 0.0)
            h = (h - mu) * lax.rsqrt(var + _LN_EPS) * vec_ref[2:3, :] \
                + vec_ref[3:4, :]

        o_ref[...] = h.astype(o_ref.dtype)

    return kernel


# --------------------------------------------------------------------------
# Wrapper-side weight preparation (constant folding + lane padding)
# --------------------------------------------------------------------------
def _prep_weights(params, bn: bool, compute_dtype=jnp.float32):
    n_input, n_units = params["w1"].shape
    n_pad = _round_up(n_units, 128)
    pad_c = lambda a: jnp.pad(a, ((0, 0), (0, n_pad - a.shape[1])))

    # Fold eval-mode BatchNorm into the first (bias-free) linear.
    scale = params["bn_gamma"] * lax.rsqrt(params["bn_var"] + _BN_EPS)  # (1, n_units)
    w1f = params["w1"] * scale
    bias1 = params["bn_beta"] - params["bn_mean"] * scale
    bias_out = params["b2"] + params["b_sc"]                            # combined bias

    w_cat = jnp.concatenate([pad_c(w1f), pad_c(params["w_sc"])], axis=1)  # (n_in, 2*Np)
    w2 = jnp.pad(params["w2"], ((0, n_pad - n_units), (0, n_pad - n_units)))

    rows = [pad_c(bias1), pad_c(bias_out)]
    if bn:
        rows += [pad_c(params["ln_gamma"]), pad_c(params["ln_beta"])]
    vec = jnp.concatenate(rows, axis=0)                                  # (k, Np)

    return (w_cat.astype(compute_dtype), w2.astype(compute_dtype),
            vec.astype(jnp.float32), n_pad)


# --------------------------------------------------------------------------
# pallas_call wrapper
# --------------------------------------------------------------------------
def mifcnet_forward(x, params, *, bn: bool, block_b: int = 512,
                    compute_dtype=jnp.float32):
    """Pallas MIFCNet forward. x: (B, n_input) -> (B, n_units) float32.

    block_b: max batch-tile (use <=256 on v5e; 512-1024 on v6e/v7x).
    compute_dtype: set jnp.bfloat16 on v6e/v7x for the native MXU path.
    """
    B, n_input = x.shape
    n_units = params["w_sc"].shape[1]
    w_cat, w2, vec, n_pad = _prep_weights(params, bn, compute_dtype)
    x_in = x.astype(compute_dtype)

    # Batch tile: sublane-aligned; aim for >= 2 grid steps when B permits so
    # the "parallel" axis can shard across v7x's two TensorCores.
    if B <= 8:
        tb = B
    else:
        tb = min(block_b, _round_up(pl.cdiv(B, 2), 8))
    grid = (pl.cdiv(B, tb),)
    # NOTE: when B % tb != 0 the last tile carries padded rows. Everything in
    # the kernel is row-local (LayerNorm reduces over axis -1 only), so padded
    # rows never contaminate valid rows and their outputs are discarded.

    dsize = jnp.dtype(compute_dtype).itemsize
    weight_bytes = (w_cat.size + w2.size) * dsize + vec.size * 4
    io_bytes = 2 * tb * (n_input * dsize + n_pad * 4)      # double-buffered x / out
    vmem_limit = int(min(max(2 * weight_bytes + 2 * io_bytes + (4 << 20),
                             16 << 20), 64 << 20))

    cost = pl.CostEstimate(
        flops=2 * B * (n_input * 2 * n_pad + n_pad * n_pad),
        transcendentals=B if bn else 0,
        bytes_accessed=int(B * n_input * dsize + B * n_pad * 4 + weight_bytes),
    )

    def build(single_buffer_weights: bool):
        def rep(shape):
            nd = len(shape)
            idx = lambda i, _nd=nd: (0,) * _nd
            if single_buffer_weights:
                # Grid-invariant weights: no point double-buffering them.
                return pl.BlockSpec(shape, idx, pipeline_mode=pl.Buffered(1))
            return pl.BlockSpec(shape, idx)

        return pl.pallas_call(
            _make_mifc_kernel(bn, n_units, n_pad),
            out_shape=jax.ShapeDtypeStruct((B, n_pad), jnp.float32),
            grid=grid,
            in_specs=[pl.BlockSpec((tb, n_input), lambda i: (i, 0)),
                      rep(w_cat.shape), rep(w2.shape), rep(vec.shape)],
            out_specs=pl.BlockSpec((tb, n_pad), lambda i: (i, 0)),
            compiler_params=pltpu.CompilerParams(
                dimension_semantics=("parallel",),
                vmem_limit_bytes=vmem_limit),
            cost_estimate=cost,
        )

    try:
        out = build(True)(x_in, w_cat, w2, vec)
    except Exception:
        # Fallback for jax versions where pipeline_mode=pl.Buffered(1) is not
        # accepted on top-level pallas_call BlockSpecs.
        out = build(False)(x_in, w_cat, w2, vec)

    return out[:, :n_units] if n_pad != n_units else out


# --------------------------------------------------------------------------
# Module port (parameter initialization mirrors the PyTorch init)
# --------------------------------------------------------------------------
class MIFCNet:
    """JAX/Pallas port of the PyTorch MIFCNet module (forward pass)."""

    def __init__(self, n_input, n_units, bn=False, *, key):
        assert n_units >= n_input
        self.bn = bn
        k1, k2, k3, k4, k5 = jax.random.split(key, 5)

        # block_nonlinear[0]: Linear(n_input, n_units, bias=False)
        bound1 = 1.0 / jnp.sqrt(jnp.float32(n_input))
        w1 = jax.random.uniform(k1, (n_input, n_units), jnp.float32, -bound1, bound1)

        # block_nonlinear[1]: BatchNorm1d(n_units) (eval-mode running stats)
        bn_gamma = jnp.ones((1, n_units), jnp.float32)
        bn_beta = jnp.zeros((1, n_units), jnp.float32)
        bn_mean = jnp.zeros((1, n_units), jnp.float32)
        bn_var = jnp.ones((1, n_units), jnp.float32)

        # block_nonlinear[3]: Linear(n_units, n_units)
        bound2 = 1.0 / jnp.sqrt(jnp.float32(n_units))
        w2 = jax.random.uniform(k2, (n_units, n_units), jnp.float32, -bound2, bound2)
        b2 = jax.random.uniform(k3, (1, n_units), jnp.float32, -bound2, bound2)

        # linear_shortcut: Linear(n_input, n_units); weight ~ U(-0.01, 0.01),
        # then the diagonal forced to 1.0 (eye_mask in the PyTorch init).
        w_sc = jax.random.uniform(k4, (n_input, n_units), jnp.float32, -0.01, 0.01)
        eye = jnp.eye(n_input, n_units, dtype=jnp.float32)
        w_sc = jnp.where(eye == 1.0, 1.0, w_sc)
        b_sc = jax.random.uniform(k5, (1, n_units), jnp.float32, -bound1, bound1)

        # block_ln: LayerNorm(n_units)
        ln_gamma = jnp.ones((1, n_units), jnp.float32)
        ln_beta = jnp.zeros((1, n_units), jnp.float32)

        self.params = dict(
            w1=w1, bn_gamma=bn_gamma, bn_beta=bn_beta, bn_mean=bn_mean,
            bn_var=bn_var, w2=w2, b2=b2, w_sc=w_sc, b_sc=b_sc,
            ln_gamma=ln_gamma, ln_beta=ln_beta,
        )

    def __call__(self, x):
        return mifcnet_forward(x, self.params, bn=self.bn)


def mifcnet_reference(x, p, *, bn: bool):
    """Pure-JAX reference of the PyTorch forward (eval-mode BatchNorm)."""
    dot = lambda a, b: jnp.dot(a, b, precision=lax.Precision.HIGHEST)
    h = dot(x, p["w1"])
    h = (h - p["bn_mean"]) / jnp.sqrt(p["bn_var"] + _BN_EPS) * p["bn_gamma"] + p["bn_beta"]
    h = jnp.where(h >= 0, h, _NEG_SLOPE * h)
    h = dot(h, p["w2"]) + p["b2"]
    h = h + dot(x, p["w_sc"]) + p["b_sc"]
    if bn:
        mu = jnp.mean(h, axis=-1, keepdims=True)
        var = jnp.mean(jnp.square(h - mu), axis=-1, keepdims=True)
        h = (h - mu) / jnp.sqrt(var + _LN_EPS) * p["ln_gamma"] + p["ln_beta"]
    return h


if __name__ == "__main__":
    key = jax.random.PRNGKey(0)
    x_key, x2_key, m_key = jax.random.split(key, 3)

    n_input, n_units = 32, 64
    x_small = jax.random.normal(x_key, (8, n_input), dtype=jnp.float32)
    x_multi = jax.random.normal(x2_key, (40, n_input), dtype=jnp.float32)  # multi-tile + partial tile

    # Tolerance note: kernel matmuls run at default MXU precision while the
    # reference uses Precision.HIGHEST; atol covers that gap on the O(1)
    # magnitude identity-shortcut path.
    def check(out, ref, tag):
        err = float(jnp.max(jnp.abs(out - ref)))
        assert out.shape == ref.shape, f"{tag}: shape {out.shape} vs {ref.shape}"
        assert jnp.allclose(out, ref, rtol=1e-3, atol=5e-3), \
            f"mismatch ({tag}): max abs err {err}"

    for bn in (False, True):
        model = MIFCNet(n_input, n_units, bn=bn, key=m_key)
        out = model(x_small)
        jax.block_until_ready(out)
        check(out, mifcnet_reference(x_small, model.params, bn=bn), f"bn={bn}, B=8")

    model = MIFCNet(n_input, n_units, bn=True, key=m_key)
    out = mifcnet_forward(x_multi, model.params, bn=True, block_b=24)
    jax.block_until_ready(out)
    check(out, mifcnet_reference(x_multi, model.params, bn=True), "bn=True, B=40")

    print("KERNEL_OK")
</pallas_src>

<mosaic_0001>
module attributes {stable_mosaic.version = 11 : i64} {
  func.func @kernel(%arg0: i32, %arg1: memref<8x32xf32, #tpu.memory_space<vmem>>, %arg2: memref<32x256xf32, #tpu.memory_space<vmem>>, %arg3: memref<128x128xf32, #tpu.memory_space<vmem>>, %arg4: memref<2x128xf32, #tpu.memory_space<vmem>>, %arg5: memref<8x128xf32, #tpu.memory_space<vmem>>) attributes {dimension_semantics = [#tpu.dimension_semantics<parallel>], iteration_bounds = array<i64: 1>, scalar_prefetch = 0 : i64, scratch_operands = 0 : i64, tpu.core_type = #tpu.core_type<tc>, window_params = [{transform_indices = @transform_0, window_bounds = array<i64: 8, 32>}, {pipeline_mode = #tpu.pipeline_mode<synchronous>, transform_indices = @transform_1, window_bounds = array<i64: 32, 256>}, {pipeline_mode = #tpu.pipeline_mode<synchronous>, transform_indices = @transform_2, window_bounds = array<i64: 128, 128>}, {pipeline_mode = #tpu.pipeline_mode<synchronous>, transform_indices = @transform_3, window_bounds = array<i64: 2, 128>}, {transform_indices = @transform_4, window_bounds = array<i64: 8, 128>}]} {
    %c0 = arith.constant 0 : index
    %c0_0 = arith.constant 0 : index
    %0 = vector.load %arg1[%c0, %c0_0] : memref<8x32xf32, #tpu.memory_space<vmem>>, vector<8x32xf32>
    %c0_1 = arith.constant 0 : index
    %c0_2 = arith.constant 0 : index
    %1 = vector.load %arg2[%c0_1, %c0_2] : memref<32x256xf32, #tpu.memory_space<vmem>>, vector<32x256xf32>
    %cst = arith.constant dense<0.000000e+00> : vector<8x256xf32>
    %2 = tpu.matmul %0, %1, %cst {dimension_numbers = #tpu.dot_dimension_numbers<[1], [0], [0], [1], [0, 0, 1, 1], [], []>} : vector<8x32xf32>, vector<32x256xf32>, vector<8x256xf32> -> vector<8x256xf32>
    %3 = vector.extract_strided_slice %2 {offsets = [0, 0], sizes = [8, 128], strides = [1, 1]} : vector<8x256xf32> to vector<8x128xf32>
    %c0_3 = arith.constant 0 : index
    %c0_4 = arith.constant 0 : index
    %4 = vector.load %arg4[%c0_3, %c0_4] : memref<2x128xf32, #tpu.memory_space<vmem>>, vector<1x128xf32>
    %5 = vector.broadcast %4 : vector<1x128xf32> to vector<8x128xf32>
    %6 = arith.addf %3, %5 : vector<8x128xf32>
    %7 = vector.extract_strided_slice %2 {offsets = [0, 128], sizes = [8, 128], strides = [1, 1]} : vector<8x256xf32> to vector<8x128xf32>
    %cst_5 = arith.constant 0.000000e+00 : f32
    %8 = vector.broadcast %cst_5 : f32 to vector<8x128xf32>
    %9 = arith.cmpf oge, %6, %8 : vector<8x128xf32>
    %cst_6 = arith.constant 2.000000e-01 : f32
    %10 = vector.broadcast %cst_6 : f32 to vector<8x128xf32>
    %11 = arith.mulf %10, %6 : vector<8x128xf32>
    %12 = arith.select %9, %6, %11 : vector<8x128xi1>, vector<8x128xf32>
    %c0_7 = arith.constant 0 : index
    %c0_8 = arith.constant 0 : index
    %13 = vector.load %arg3[%c0_7, %c0_8] : memref<128x128xf32, #tpu.memory_space<vmem>>, vector<128x128xf32>
    %cst_9 = arith.constant dense<0.000000e+00> : vector<8x128xf32>
    %14 = tpu.matmul %12, %13, %cst_9 {dimension_numbers = #tpu.dot_dimension_numbers<[1], [0], [0], [1], [0, 0, 1, 1], [], []>} : vector<8x128xf32>, vector<128x128xf32>, vector<8x128xf32> -> vector<8x128xf32>
    %c1 = arith.constant 1 : index
    %c0_10 = arith.constant 0 : index
    %15 = vector.load %arg4[%c1, %c0_10] : memref<2x128xf32, #tpu.memory_space<vmem>>, vector<1x128xf32>
    %16 = vector.broadcast %15 : vector<1x128xf32> to vector<8x128xf32>
    %17 = arith.addf %14, %16 : vector<8x128xf32>
    %18 = arith.addf %17, %7 : vector<8x128xf32>
    %c0_11 = arith.constant 0 : index
    %c0_12 = arith.constant 0 : index
    %19 = vector.load %arg5[%c0_11, %c0_12] : memref<8x128xf32, #tpu.memory_space<vmem>>, vector<8x128xf32>
    tpu.vector_store %arg5[%c0_11, %c0_12], %18 {strides = array<i32>} : memref<8x128xf32, #tpu.memory_space<vmem>>, vector<8x128xf32>,
    return
  }
  func.func @transform_0(%arg0: i32) -> (i32, i32) {
    %c0_i32 = arith.constant 0 : i32
    %c0_i32_0 = arith.constant 0 : i32
    return %arg0, %c0_i32 : i32, i32
  }
  func.func @transform_1(%arg0: i32) -> (i32, i32) {
    %c0_i32 = arith.constant 0 : i32
    %c0_i32_0 = arith.constant 0 : i32
    %c0_i32_1 = arith.constant 0 : i32
    return %c0_i32, %c0_i32_0 : i32, i32
  }
  func.func @transform_2(%arg0: i32) -> (i32, i32) {
    %c0_i32 = arith.constant 0 : i32
    %c0_i32_0 = arith.constant 0 : i32
    %c0_i32_1 = arith.constant 0 : i32
    return %c0_i32, %c0_i32_0 : i32, i32
  }
  func.func @transform_3(%arg0: i32) -> (i32, i32) {
    %c0_i32 = arith.constant 0 : i32
    %c0_i32_0 = arith.constant 0 : i32
    %c0_i32_1 = arith.constant 0 : i32
    return %c0_i32, %c0_i32_0 : i32, i32
  }
  func.func @transform_4(%arg0: i32) -> (i32, i32) {
    %c0_i32 = arith.constant 0 : i32
    %c0_i32_0 = arith.constant 0 : i32
    return %arg0, %c0_i32 : i32, i32
  }
}

module attributes {stable_mosaic.version = 11 : i64} {
  func.func @kernel(%arg0: i32, %arg1: memref<8x32xf32, #tpu.memory_space<vmem>>, %arg2: memref<32x256xf32, #tpu.memory_space<vmem>>, %arg3: memref<128x128xf32, #tpu.memory_space<vmem>>, %arg4: memref<2x128xf32, #tpu.memory_space<vmem>>, %arg5: memref<8x128xf32, #tpu.memory_space<vmem>>) attributes {dimension_semantics = [#tpu.dimension_semantics<parallel>], iteration_bounds = array<i64: 1>, scalar_prefetch = 0 : i64, scratch_operands = 0 : i64, tpu.core_type = #tpu.core_type<tc>, window_params = [{transform_indices = @transform_0, window_bounds = array<i64: 8, 32>}, {pipeline_mode = #tpu.pipeline_mode<synchronous>, transform_indices = @transform_1, window_bounds = array<i64: 32, 256>}, {pipeline_mode = #tpu.pipeline_mode<synchronous>, transform_indices = @transform_2, window_bounds = array<i64: 128, 128>}, {pipeline_mode = #tpu.pipeline_mode<synchronous>, transform_indices = @transform_3, window_bounds = array<i64: 2, 128>}, {transform_indices = @transform_4, window_bounds = array<i64: 8, 128>}]} {
    %c0 = arith.constant 0 : index
    %c0_0 = arith.constant 0 : index
    %0 = vector.load %arg1[%c0, %c0_0] : memref<8x32xf32, #tpu.memory_space<vmem>>, vector<8x32xf32>
    %c0_1 = arith.constant 0 : index
    %c0_2 = arith.constant 0 : index
    %1 = vector.load %arg2[%c0_1, %c0_2] : memref<32x256xf32, #tpu.memory_space<vmem>>, vector<32x256xf32>
    %cst = arith.constant dense<0.000000e+00> : vector<8x256xf32>
    %2 = tpu.matmul %0, %1, %cst {dimension_numbers = #tpu.dot_dimension_numbers<[1], [0], [0], [1], [0, 0, 1, 1], [], []>} : vector<8x32xf32>, vector<32x256xf32>, vector<8x256xf32> -> vector<8x256xf32>
    %3 = vector.extract_strided_slice %2 {offsets = [0, 0], sizes = [8, 128], strides = [1, 1]} : vector<8x256xf32> to vector<8x128xf32>
    %c0_3 = arith.constant 0 : index
    %c0_4 = arith.constant 0 : index
    %4 = vector.load %arg4[%c0_3, %c0_4] : memref<2x128xf32, #tpu.memory_space<vmem>>, vector<1x128xf32>
    %5 = vector.broadcast %4 : vector<1x128xf32> to vector<8x128xf32>
    %6 = arith.addf %3, %5 : vector<8x128xf32>
    %7 = vector.extract_strided_slice %2 {offsets = [0, 128], sizes = [8, 128], strides = [1, 1]} : vector<8x256xf32> to vector<8x128xf32>
    %cst_5 = arith.constant 0.000000e+00 : f32
    %8 = vector.broadcast %cst_5 : f32 to vector<8x128xf32>
    %9 = arith.cmpf oge, %6, %8 : vector<8x128xf32>
    %cst_6 = arith.constant 2.000000e-01 : f32
    %10 = vector.broadcast %cst_6 : f32 to vector<8x128xf32>
    %11 = arith.mulf %10, %6 : vector<8x128xf32>
    %12 = arith.select %9, %6, %11 : vector<8x128xi1>, vector<8x128xf32>
    %c0_7 = arith.constant 0 : index
    %c0_8 = arith.constant 0 : index
    %13 = vector.load %arg3[%c0_7, %c0_8] : memref<128x128xf32, #tpu.memory_space<vmem>>, vector<128x128xf32>
    %cst_9 = arith.constant dense<0.000000e+00> : vector<8x128xf32>
    %14 = tpu.matmul %12, %13, %cst_9 {dimension_numbers = #tpu.dot_dimension_numbers<[1], [0], [0], [1], [0, 0, 1, 1], [], []>} : vector<8x128xf32>, vector<128x128xf32>, vector<8x128xf32> -> vector<8x128xf32>
    %c1 = arith.constant 1 : index
    %c0_10 = arith.constant 0 : index
    %15 = vector.load %arg4[%c1, %c0_10] : memref<2x128xf32, #tpu.memory_space<vmem>>, vector<1x128xf32>
    %16 = vector.broadcast %15 : vector<1x128xf32> to vector<8x128xf32>
    %17 = arith.addf %14, %16 : vector<8x128xf32>
    %18 = arith.addf %17, %7 : vector<8x128xf32>
    %c0_11 = arith.constant 0 : index
    %c0_12 = arith.constant 0 : index
    %19 = vector.load %arg5[%c0_11, %c0_12] : memref<8x128xf32, #tpu.memory_space<vmem>>, vector<8x128xf32>
    tpu.vector_store %arg5[%c0_11, %c0_12], %18 {strides = array<i32>} : memref<8x128xf32, #tpu.memory_space<vmem>>, vector<8x128xf32>,
    return
  }
  func.func @transform_0(%arg0: i32) -> (i32, i32) {
    %c0_i32 = arith.constant 0 : i32
    %c0_i32_0 = arith.constant 0 : i32
    return %arg0, %c0_i32 : i32, i32
  }
  func.func @transform_1(%arg0: i32) -> (i32, i32) {
    %c0_i32 = arith.constant 0 : i32
    %c0_i32_0 = arith.constant 0 : i32
    %c0_i32_1 = arith.constant 0 : i32
    return %c0_i32, %c0_i32_0 : i32, i32
  }
  func.func @transform_2(%arg0: i32) -> (i32, i32) {
    %c0_i32 = arith.constant 0 : i32
    %c0_i32_0 = arith.constant 0 : i32
    %c0_i32_1 = arith.constant 0 : i32
    return %c0_i32, %c0_i32_0 : i32, i32
  }
  func.func @transform_3(%arg0: i32) -> (i32, i32) {
    %c0_i32 = arith.constant 0 : i32
    %c0_i32_0 = arith.constant 0 : i32
    %c0_i32_1 = arith.constant 0 : i32
    return %c0_i32, %c0_i32_0 : i32, i32
  }
  func.func @transform_4(%arg0: i32) -> (i32, i32) {
    %c0_i32 = arith.constant 0 : i32
    %c0_i32_0 = arith.constant 0 : i32
    return %arg0, %c0_i32 : i32, i32
  }
}

</mosaic_0001>

<bundles_post_ra>
// kernel: tpu_custom_call.1
= control target key start
LH: loop header
LB: loop body
LE: loop exit
PB: predicated region body
PF: predicated region fallthrough
CT: control target
= control target key end

     0   :  { %9 = vsyncpa [#allocation3], 0  ;;  %s543_s0 = inlined_call_operand.hbm [shape: f32[8,32], index: 0, kind: input, shape index: {}]   ;;  %s544_s1 = inlined_call_operand.hbm [shape: f32[32,256], index: 1, kind: input, shape index: {}]   ;;  %s545_s2 = inlined_call_operand.hbm [shape: f32[128,128], index: 2, kind: input, shape index: {}]   ;;  %s546_s3 = inlined_call_operand.vmem [shape: f32[2,128], index: 3, kind: input, shape index: {}]   ;;  %s547_s4 = inlined_call_operand.hbm [shape: f32[8,128], index: 4, kind: output, shape index: {}]  }
   0x1   :  { %10 = vsyncpa [#allocation6], 0 }
   0x2   :  { %11 = vsyncpa [#allocation4], 0  ;;  %s451_s15 = smov [#allocation5]   ;;  %s357_s19 = scalar_lea.hbm %s544_s1, 1024 }
   0x3   :  { %s27_s16 = sshll.u32 %s451_s15, 4  ;;  %p358_p0 = scmp.ne.s32.totalorder %s544_s1, %s357_s19  ;;  %s28_s16 = int_to_ptr.vmem [resolvable:$true] %s27_s16 }
   0x4   :  { %p361_p1 = scmp.lt.u32.totalorder %s357_s19, %s544_s1 }
   0x6   :  { %p363_p2 = pnand %p361_p1, %p358_p0 }
   0x8   :  { %366 = shalt.err (!%p363_p2)
}
   0x9   :  { %s367_s24 = scalar_lea.vmem %s28_s16, 1024  ;;  %p372_p4 = scmp.lt.s32.totalorder %s28_s16, %s28_s16 }
   0xa   :  { %p368_p3 = scmp.ne.s32.totalorder %s28_s16, %s367_s24  ;;  %p373_p5 = scmp.lt.s32.totalorder %s367_s24, %s367_s24 }
   0xc   :  { %p374_p6 = por %p373_p5, %p372_p4 }
   0xe   :  { %p375_p7 = pnand %p374_p6, %p368_p3 }
  0x10   :  { %378 = shalt.err (!%p375_p7)
}
  0x11   :  { %s452_s25 = smov 256   ;;  %s453_s26 = smov 16  }
  0x12   :  { %33 = dma.hbm_to_vmem [thread:$0]  %s544_s1, 1024, %s28_s16, [#allocation6], %s452_s25, %s452_s25, %s453_s26  }
  0x13   :  { %s454_s29 = smov [#allocation2]   ;;  %s455_s5 = smov [#allocation7]  }
  0x14   :  { %s18_s30 = sshll.u32 %s454_s29, 4  ;;  %s39_s6 = sshll.u32 %s455_s5, 4  ;;  %s19_s30 = int_to_ptr.vmem [resolvable:$true] %s18_s30  ;;  %s40_s6 = int_to_ptr.vmem [resolvable:$true] %s39_s6 }
  0x15   :  { %s379_s9 = scalar_lea.hbm %s543_s0, 128 }
  0x16   :  { %p380_p8 = scmp.ne.s32.totalorder %s543_s0, %s379_s9  ;;  %p383_p9 = scmp.lt.u32.totalorder %s379_s9, %s543_s0 }
  0x18   :  { %p385_p10 = pnand %p383_p9, %p380_p8 }
  0x1a   :  { %388 = shalt.err (!%p385_p10)
}
  0x1b   :  { %s389_s1 = scalar_lea.vmem %s19_s30, 128  ;;  %p394_p12 = scmp.lt.s32.totalorder %s19_s30, %s19_s30 }
  0x1c   :  { %p390_p11 = scmp.ne.s32.totalorder %s19_s30, %s389_s1  ;;  %p395_p13 = scmp.lt.s32.totalorder %s389_s1, %s389_s1 }
  0x1e   :  { %p396_p0 = por %p395_p13, %p394_p12 }
  0x20   :  { %p397_p1 = pnand %p396_p0, %p390_p11 }
  0x22   :  { %400 = shalt.err (!%p397_p1)
}
  0x23   :  { %21 = dma.hbm_to_vmem [thread:$0]  %s543_s0, 128, %s19_s30, [#allocation3]  }
  0x24   :  { %s401_s18 = scalar_lea.hbm %s545_s2, 2048 }
  0x25   :  { %p402_p2 = scmp.ne.s32.totalorder %s545_s2, %s401_s18  ;;  %p405_p3 = scmp.lt.u32.totalorder %s401_s18, %s545_s2 }
  0x27   :  { %p407_p4 = pnand %p405_p3, %p402_p2 }
  0x29   :  { %410 = shalt.err (!%p407_p4)
}
  0x2a   :  { %s411_s23 = scalar_lea.vmem %s40_s6, 2048  ;;  %p416_p6 = scmp.lt.s32.totalorder %s40_s6, %s40_s6 }
  0x2b   :  { %p412_p5 = scmp.ne.s32.totalorder %s40_s6, %s411_s23  ;;  %p417_p7 = scmp.lt.s32.totalorder %s411_s23, %s411_s23 }
  0x2d   :  { %p418_p8 = por %p417_p7, %p416_p6 }
  0x2f   :  { %p419_p9 = pnand %p418_p8, %p412_p5 }
  0x31   :  { %422 = shalt.err (!%p419_p9)
}
  0x32   :  { %s456_s0 = smov 128   ;;  %s457_s24 = smov 8  }
  0x33   :  { %45 = dma.hbm_to_vmem [thread:$0]  %s545_s2, 2048, %s40_s6, [#allocation6], %s456_s0, %s456_s0, %s457_s24  }
  0x34   :  { %445 = dma.done.wait [#allocation3], 128  }
  0x35   :  { %446 = vsyncadd [#allocation3], 4294967168 }
  0x36   :  { %447 = dma.done.wait [#allocation6], 3072  }
  0x37   :  { %448 = vsyncadd [#allocation6], 4294964224  ;;  %v458_v0 = vmov 0.0   ;;  %v459_v1 = vmov 0.0|0.0   ;;  %v59_v2 = vld [vmem:[#allocation5 + $0x8] sm:$0xff]  ;;  %v61_v3 = vld [vmem:[#allocation5 + $0x18] sm:$0xff] }
  0x38   :  { %134 = vmatprep.mubr.f32.mxu0 %v458_v0  ;;  %322 = vmatprep.subr.bf16.mxu1 %v459_v1  ;;  %v58_v4 = vld [vmem:[#allocation5] sm:$0xff]  ;;  %v314_v5 = vpack.c.bf16 %v61_v3, %v59_v2  ;;  %v60_v6 = vld [vmem:[#allocation5 + $0x10] sm:$0xff]  ;;  %v63_v7 = vld [vmem:[#allocation5 + $0x28] sm:$0xff]  ;;  %vm66_vm0 = vcmask 261120   ;;  %vm460_vm1 = vmmov 0   ;;  %s461_s30 = smov [#allocation8]  }
  0x39   :  { %v65_v8 = vld [vmem:[#allocation5 + $0x38] sm:$0xff]  ;;  %v316_v9 = vpack.c.bf16 %v60_v6, %v58_v4  ;;  %v62_v11 = vld [vmem:[#allocation5 + $0x20] sm:$0xff]  ;;  %v64_v12 = vld [vmem:[#allocation5 + $0x30] sm:$0xff]  ;;  %311 = vmatprep.mubr.msk.f32.mxu1 %vm460_vm1, %v458_v0  ;;  %s249_s5 = sshll.u32 %s461_s30, 4  ;;  %s250_s5 = int_to_ptr.vmem [resolvable:$true] %s249_s5 }
  0x3a   :  { %v318_v10 = vpack.c.bf16 %v65_v8, %v63_v7  ;;  %315 = vmatprep.subr.bf16.mxu0 %v314_v5  ;;  %v150_v13 = vld [vmem:[#allocation7] sm:$0xff]  ;;  %v151_v14 = vld [vmem:[#allocation7 + $0x8] sm:$0xff]  ;;  %v152_v15 = vld [vmem:[#allocation7 + $0x10] sm:$0xff]  ;;  %v320_v16 = vpack.c.bf16 %v64_v12, %v62_v11  ;;  %s423_s6 = scalar_lea.vmem %s250_s5, 128  ;;  %p428_p11 = scmp.lt.s32.totalorder %s250_s5, %s250_s5 }
  0x3b   :  { %317 = vmatpush1.bf16.msra.mxu0 %v316_v9  ;;  %v323_v17 = vpack.c.bf16 %v151_v14, %v150_v13  ;;  %v153_v18 = vld [vmem:[#allocation7 + $0x18] sm:$0xff]  ;;  %v154_v20 = vld [vmem:[#allocation7 + $0x20] sm:$0xff]  ;;  %v155_v21 = vld [vmem:[#allocation7 + $0x28] sm:$0xff]  ;;  %p424_p10 = scmp.ne.s32.totalorder %s250_s5, %s423_s6  ;;  %p429_p12 = scmp.lt.s32.totalorder %s423_s6, %s423_s6 }
  0x3c   :  { %319 = vmatprep.subr.bf16.mxu0 %v318_v10  ;;  %v326_v19 = vpack.c.bf16 %v153_v18, %v152_v15  ;;  %v57_v22 = vld [vmem:[#allocation2] sm:$0xff]  ;;  %v329_v23 = vpack.c.bf16 %v155_v21, %v154_v20  ;;  %v156_v24 = vld [vmem:[#allocation7 + $0x30] sm:$0xff]  ;;  %v158_v27 = vld [vmem:[#allocation7 + $0x40] sm:$0xff] }
  0x3d   :  { %324 = vmatpush3.bf16.msra.mxu1 %v323_v17  ;;  %v157_v25 = vld [vmem:[#allocation7 + $0x38] sm:$0xff]  ;;  %v159_v28 = vld [vmem:[#allocation7 + $0x48] sm:$0xff]  ;;  %v160_v30 = vld [vmem:[#allocation7 + $0x50] sm:$0xff]  ;;  %p430_p13 = por %p429_p12, %p428_p11 }
  0x3e   :  { %325 = vmatprep.subr.bf16.mxu1 %v459_v1  ;;  %v332_v26 = vpack.c.bf16 %v157_v25, %v156_v24  ;;  %v335_v29 = vpack.c.bf16 %v159_v28, %v158_v27  ;;  %v161_v31 = vld [vmem:[#allocation7 + $0x58] sm:$0xff]  ;;  %v162_v33 = vld [vmem:[#allocation7 + $0x60] sm:$0xff]  ;;  %v163_v34 = vld [vmem:[#allocation7 + $0x68] sm:$0xff] }
  0x3f   :  { %321 = vmatpush1.bf16.msra.mxu0 %v320_v16  ;;  %v338_v32 = vpack.c.bf16 %v161_v31, %v160_v30  ;;  %v341_v35 = vpack.c.bf16 %v163_v34, %v162_v33  ;;  %v164_v36 = vld [vmem:[#allocation7 + $0x70] sm:$0xff]  ;;  %v165_v37 = vld [vmem:[#allocation7 + $0x78] sm:$0xff]  ;;  %p431_p0 = pnand %p430_p13, %p424_p10 }
  0x40   :  { %v344_v38 = vpack.c.bf16 %v165_v37, %v164_v36  ;;  %v260_v39 = vld [vmem:[%s546_s3] ss:$0 sm:$0xff]  ;;  %v261_v45 = vld [vmem:[%s546_s3 + $0x1] ss:$0 sm:$0xff] }
  0x41   :  { %327 = vmatpush3.bf16.msra.mxu1 %v326_v19 }
  0x42   :  { %259 = vmatmul.mubr.msk.f32.vlgmr.msra.gmra.mrb[0].mxu0 %vm66_vm0, %v57_v22  ;;  %328 = vmatprep.subr.bf16.mxu1 %v459_v1 }
  0x45   :  { %330 = vmatpush3.bf16.msra.mxu1 %v329_v23 }
  0x46   :  { %331 = vmatprep.subr.bf16.mxu1 %v459_v1 }
  0x49   :  { %333 = vmatpush3.bf16.msra.mxu1 %v332_v26 }
  0x4a   :  { %334 = vmatprep.subr.bf16.mxu1 %v459_v1 }
  0x4d   :  { %336 = vmatpush3.bf16.msra.mxu1 %v335_v29 }
  0x4e   :  { %337 = vmatprep.subr.bf16.mxu1 %v459_v1 }
  0x51   :  { %339 = vmatpush3.bf16.msra.mxu1 %v338_v32 }
  0x52   :  { %340 = vmatprep.subr.bf16.mxu1 %v459_v1 }
  0x55   :  { %342 = vmatpush3.bf16.msra.mxu1 %v341_v35 }
  0x56   :  { %343 = vmatprep.subr.bf16.mxu1 %v459_v1 }
  0x59   :  { %345 = vmatpush3.bf16.msra.mxu1 %v344_v38 }
 0x115   :  { %v136_v40 = vpop.f32.mrb[0].mxu0 }
 0x116   :  { %v146_v41 = vadd.f32 %v260_v39, %v136_v40  ;;  %v138_v42 = vpop.f32.mrb[1].mxu0 }
 0x118   :  { %v148_v43 = vmul.f32 0.2, %v146_v41  ;;  %vm147_vm2 = vcmp.ge.f32.partialorder %v146_v41, 0.0 }
 0x11a   :  { %v149_v44 = vsel %vm147_vm2, %v146_v41, %v148_v43 }
 0x11b   :  { %312 = vmatmul.mubr.f32.vlgmr.msra.gmra.mrb[0].mxu1 %v149_v44 }
 0x1ee   :  { %v237_v46 = vpop.f32.mrb[0].mxu1 }
 0x1ef   :  { %v238_v47 = vadd.f32 %v261_v45, %v237_v46  ;;  %v313_v48 = vpop.f32.mrb[1].mxu1 }
 0x1f1   :  { %v241_v49 = vadd.f32 %v238_v47, %v138_v42 }
 0x1f3   :  { %242 = vst [vmem:[#allocation8] sm:$0xff] %v241_v49 }
 0x1f4   :  { %434 = shalt.err (!%p431_p0)
}
 0x1f5   :  { %s435_s9 = scalar_lea.hbm %s547_s4, 128 }
 0x1f6   :  { %p436_p1 = scmp.ne.s32.totalorder %s547_s4, %s435_s9  ;;  %p439_p2 = scmp.lt.u32.totalorder %s435_s9, %s547_s4 }
 0x1f8   :  { %p441_p3 = pnand %p439_p2, %p436_p1 }
 0x1fa   :  { %444 = shalt.err (!%p441_p3)
}
 0x1fb   :  { %252 = dma.vmem_to_hbm [thread:$0]  %s250_s5, 128, %s547_s4, [#allocation4]  }
 0x1fc   :  { %449 = dma.done.wait [#allocation4], 128  }
 0x1fd   :  { %450 = vsyncadd [#allocation4], 4294967168 }
 0x1fe   :  { %256 = vsyncpa [#allocation3], 1 }
 0x1ff   :  { %257 = vsyncpa [#allocation6], 1 }
 0x200   :  { %258 = vsyncpa [#allocation4], 1 }

// kernel: tpu_custom_call.1
= control target key start
LH: loop header
LB: loop body
LE: loop exit
PB: predicated region body
PF: predicated region fallthrough
CT: control target
= control target key end

     0   :  { %9 = vsyncpa [#allocation3], 0  ;;  %s543_s0 = inlined_call_operand.hbm [shape: f32[8,32], index: 0, kind: input, shape index: {}]   ;;  %s544_s1 = inlined_call_operand.hbm [shape: f32[32,256], index: 1, kind: input, shape index: {}]   ;;  %s545_s2 = inlined_call_operand.hbm [shape: f32[128,128], index: 2, kind: input, shape index: {}]   ;;  %s546_s3 = inlined_call_operand.vmem [shape: f32[2,128], index: 3, kind: input, shape index: {}]   ;;  %s547_s4 = inlined_call_operand.hbm [shape: f32[8,128], index: 4, kind: output, shape index: {}]  }
   0x1   :  { %10 = vsyncpa [#allocation6], 0 }
   0x2   :  { %11 = vsyncpa [#allocation4], 0  ;;  %s451_s15 = smov [#allocation5]   ;;  %s357_s19 = scalar_lea.hbm %s544_s1, 1024 }
   0x3   :  { %s27_s16 = sshll.u32 %s451_s15, 4  ;;  %p358_p0 = scmp.ne.s32.totalorder %s544_s1, %s357_s19  ;;  %s28_s16 = int_to_ptr.vmem [resolvable:$true] %s27_s16 }
   0x4   :  { %p361_p1 = scmp.lt.u32.totalorder %s357_s19, %s544_s1 }
   0x6   :  { %p363_p2 = pnand %p361_p1, %p358_p0 }
   0x8   :  { %366 = shalt.err (!%p363_p2)
}
   0x9   :  { %s367_s24 = scalar_lea.vmem %s28_s16, 1024  ;;  %p372_p4 = scmp.lt.s32.totalorder %s28_s16, %s28_s16 }
   0xa   :  { %p368_p3 = scmp.ne.s32.totalorder %s28_s16, %s367_s24  ;;  %p373_p5 = scmp.lt.s32.totalorder %s367_s24, %s367_s24 }
   0xc   :  { %p374_p6 = por %p373_p5, %p372_p4 }
   0xe   :  { %p375_p7 = pnand %p374_p6, %p368_p3 }
  0x10   :  { %378 = shalt.err (!%p375_p7)
}
  0x11   :  { %s452_s25 = smov 256   ;;  %s453_s26 = smov 16  }
  0x12   :  { %33 = dma.hbm_to_vmem [thread:$0]  %s544_s1, 1024, %s28_s16, [#allocation6], %s452_s25, %s452_s25, %s453_s26  }
  0x13   :  { %s454_s29 = smov [#allocation2]   ;;  %s455_s5 = smov [#allocation7]  }
  0x14   :  { %s18_s30 = sshll.u32 %s454_s29, 4  ;;  %s39_s6 = sshll.u32 %s455_s5, 4  ;;  %s19_s30 = int_to_ptr.vmem [resolvable:$true] %s18_s30  ;;  %s40_s6 = int_to_ptr.vmem [resolvable:$true] %s39_s6 }
  0x15   :  { %s379_s9 = scalar_lea.hbm %s543_s0, 128 }
  0x16   :  { %p380_p8 = scmp.ne.s32.totalorder %s543_s0, %s379_s9  ;;  %p383_p9 = scmp.lt.u32.totalorder %s379_s9, %s543_s0 }
  0x18   :  { %p385_p10 = pnand %p383_p9, %p380_p8 }
  0x1a   :  { %388 = shalt.err (!%p385_p10)
}
  0x1b   :  { %s389_s1 = scalar_lea.vmem %s19_s30, 128  ;;  %p394_p12 = scmp.lt.s32.totalorder %s19_s30, %s19_s30 }
  0x1c   :  { %p390_p11 = scmp.ne.s32.totalorder %s19_s30, %s389_s1  ;;  %p395_p13 = scmp.lt.s32.totalorder %s389_s1, %s389_s1 }
  0x1e   :  { %p396_p0 = por %p395_p13, %p394_p12 }
  0x20   :  { %p397_p1 = pnand %p396_p0, %p390_p11 }
  0x22   :  { %400 = shalt.err (!%p397_p1)
}
  0x23   :  { %21 = dma.hbm_to_vmem [thread:$0]  %s543_s0, 128, %s19_s30, [#allocation3]  }
  0x24   :  { %s401_s18 = scalar_lea.hbm %s545_s2, 2048 }
  0x25   :  { %p402_p2 = scmp.ne.s32.totalorder %s545_s2, %s401_s18  ;;  %p405_p3 = scmp.lt.u32.totalorder %s401_s18, %s545_s2 }
  0x27   :  { %p407_p4 = pnand %p405_p3, %p402_p2 }
  0x29   :  { %410 = shalt.err (!%p407_p4)
}
  0x2a   :  { %s411_s23 = scalar_lea.vmem %s40_s6, 2048  ;;  %p416_p6 = scmp.lt.s32.totalorder %s40_s6, %s40_s6 }
  0x2b   :  { %p412_p5 = scmp.ne.s32.totalorder %s40_s6, %s411_s23  ;;  %p417_p7 = scmp.lt.s32.totalorder %s411_s23, %s411_s23 }
  0x2d   :  { %p418_p8 = por %p417_p7, %p416_p6 }
  0x2f   :  { %p419_p9 = pnand %p418_p8, %p412_p5 }
  0x31   :  { %422 = shalt.err (!%p419_p9)
}
  0x32   :  { %s456_s0 = smov 128   ;;  %s457_s24 = smov 8  }
  0x33   :  { %45 = dma.hbm_to_vmem [thread:$0]  %s545_s2, 2048, %s40_s6, [#allocation6], %s456_s0, %s456_s0, %s457_s24  }
  0x34   :  { %445 = dma.done.wait [#allocation3], 128  }
  0x35   :  { %446 = vsyncadd [#allocation3], 4294967168 }
  0x36   :  { %447 = dma.done.wait [#allocation6], 3072  }
  0x37   :  { %448 = vsyncadd [#allocation6], 4294964224  ;;  %v458_v0 = vmov 0.0   ;;  %v459_v1 = vmov 0.0|0.0   ;;  %v59_v2 = vld [vmem:[#allocation5 + $0x8] sm:$0xff]  ;;  %v61_v3 = vld [vmem:[#allocation5 + $0x18] sm:$0xff] }
  0x38   :  { %134 = vmatprep.mubr.f32.mxu0 %v458_v0  ;;  %322 = vmatprep.subr.bf16.mxu1 %v459_v1  ;;  %v58_v4 = vld [vmem:[#allocation5] sm:$0xff]  ;;  %v314_v5 = vpack.c.bf16 %v61_v3, %v59_v2  ;;  %v60_v6 = vld [vmem:[#allocation5 + $0x10] sm:$0xff]  ;;  %v63_v7 = vld [vmem:[#allocation5 + $0x28] sm:$0xff]  ;;  %vm66_vm0 = vcmask 261120   ;;  %vm460_vm1 = vmmov 0   ;;  %s461_s30 = smov [#allocation8]  }
  0x39   :  { %v65_v8 = vld [vmem:[#allocation5 + $0x38] sm:$0xff]  ;;  %v316_v9 = vpack.c.bf16 %v60_v6, %v58_v4  ;;  %v62_v11 = vld [vmem:[#allocation5 + $0x20] sm:$0xff]  ;;  %v64_v12 = vld [vmem:[#allocation5 + $0x30] sm:$0xff]  ;;  %311 = vmatprep.mubr.msk.f32.mxu1 %vm460_vm1, %v458_v0  ;;  %s249_s5 = sshll.u32 %s461_s30, 4  ;;  %s250_s5 = int_to_ptr.vmem [resolvable:$true] %s249_s5 }
  0x3a   :  { %v318_v10 = vpack.c.bf16 %v65_v8, %v63_v7  ;;  %315 = vmatprep.subr.bf16.mxu0 %v314_v5  ;;  %v150_v13 = vld [vmem:[#allocation7] sm:$0xff]  ;;  %v151_v14 = vld [vmem:[#allocation7 + $0x8] sm:$0xff]  ;;  %v152_v15 = vld [vmem:[#allocation7 + $0x10] sm:$0xff]  ;;  %v320_v16 = vpack.c.bf16 %v64_v12, %v62_v11  ;;  %s423_s6 = scalar_lea.vmem %s250_s5, 128  ;;  %p428_p11 = scmp.lt.s32.totalorder %s250_s5, %s250_s5 }
  0x3b   :  { %317 = vmatpush1.bf16.msra.mxu0 %v316_v9  ;;  %v323_v17 = vpack.c.bf16 %v151_v14, %v150_v13  ;;  %v153_v18 = vld [vmem:[#allocation7 + $0x18] sm:$0xff]  ;;  %v154_v20 = vld [vmem:[#allocation7 + $0x20] sm:$0xff]  ;;  %v155_v21 = vld [vmem:[#allocation7 + $0x28] sm:$0xff]  ;;  %p424_p10 = scmp.ne.s32.totalorder %s250_s5, %s423_s6  ;;  %p429_p12 = scmp.lt.s32.totalorder %s423_s6, %s423_s6 }
  0x3c   :  { %319 = vmatprep.subr.bf16.mxu0 %v318_v10  ;;  %v326_v19 = vpack.c.bf16 %v153_v18, %v152_v15  ;;  %v57_v22 = vld [vmem:[#allocation2] sm:$0xff]  ;;  %v329_v23 = vpack.c.bf16 %v155_v21, %v154_v20  ;;  %v156_v24 = vld [vmem:[#allocation7 + $0x30] sm:$0xff]  ;;  %v158_v27 = vld [vmem:[#allocation7 + $0x40] sm:$0xff] }
  0x3d   :  { %324 = vmatpush3.bf16.msra.mxu1 %v323_v17  ;;  %v157_v25 = vld [vmem:[#allocation7 + $0x38] sm:$0xff]  ;;  %v159_v28 = vld [vmem:[#allocation7 + $0x48] sm:$0xff]  ;;  %v160_v30 = vld [vmem:[#allocation7 + $0x50] sm:$0xff]  ;;  %p430_p13 = por %p429_p12, %p428_p11 }
  0x3e   :  { %325 = vmatprep.subr.bf16.mxu1 %v459_v1  ;;  %v332_v26 = vpack.c.bf16 %v157_v25, %v156_v24  ;;  %v335_v29 = vpack.c.bf16 %v159_v28, %v158_v27  ;;  %v161_v31 = vld [vmem:[#allocation7 + $0x58] sm:$0xff]  ;;  %v162_v33 = vld [vmem:[#allocation7 + $0x60] sm:$0xff]  ;;  %v163_v34 = vld [vmem:[#allocation7 + $0x68] sm:$0xff] }
  0x3f   :  { %321 = vmatpush1.bf16.msra.mxu0 %v320_v16  ;;  %v338_v32 = vpack.c.bf16 %v161_v31, %v160_v30  ;;  %v341_v35 = vpack.c.bf16 %v163_v34, %v162_v33  ;;  %v164_v36 = vld [vmem:[#allocation7 + $0x70] sm:$0xff]  ;;  %v165_v37 = vld [vmem:[#allocation7 + $0x78] sm:$0xff]  ;;  %p431_p0 = pnand %p430_p13, %p424_p10 }
  0x40   :  { %v344_v38 = vpack.c.bf16 %v165_v37, %v164_v36  ;;  %v260_v39 = vld [vmem:[%s546_s3] ss:$0 sm:$0xff]  ;;  %v261_v45 = vld [vmem:[%s546_s3 + $0x1] ss:$0 sm:$0xff] }
  0x41   :  { %327 = vmatpush3.bf16.msra.mxu1 %v326_v19 }
  0x42   :  { %259 = vmatmul.mubr.msk.f32.vlgmr.msra.gmra.mrb[0].mxu0 %vm66_vm0, %v57_v22  ;;  %328 = vmatprep.subr.bf16.mxu1 %v459_v1 }
  0x45   :  { %330 = vmatpush3.bf16.msra.mxu1 %v329_v23 }
  0x46   :  { %331 = vmatprep.subr.bf16.mxu1 %v459_v1 }
  0x49   :  { %333 = vmatpush3.bf16.msra.mxu1 %v332_v26 }
  0x4a   :  { %334 = vmatprep.subr.bf16.mxu1 %v459_v1 }
  0x4d   :  { %336 = vmatpush3.bf16.msra.mxu1 %v335_v29 }
  0x4e   :  { %337 = vmatprep.subr.bf16.mxu1 %v459_v1 }
  0x51   :  { %339 = vmatpush3.bf16.msra.mxu1 %v338_v32 }
  0x52   :  { %340 = vmatprep.subr.bf16.mxu1 %v459_v1 }
  0x55   :  { %342 = vmatpush3.bf16.msra.mxu1 %v341_v35 }
  0x56   :  { %343 = vmatprep.subr.bf16.mxu1 %v459_v1 }
  0x59   :  { %345 = vmatpush3.bf16.msra.mxu1 %v344_v38 }
 0x115   :  { %v136_v40 = vpop.f32.mrb[0].mxu0 }
 0x116   :  { %v146_v41 = vadd.f32 %v260_v39, %v136_v40  ;;  %v138_v42 = vpop.f32.mrb[1].mxu0 }
 0x118   :  { %v148_v43 = vmul.f32 0.2, %v146_v41  ;;  %vm147_vm2 = vcmp.ge.f32.partialorder %v146_v41, 0.0 }
 0x11a   :  { %v149_v44 = vsel %vm147_vm2, %v146_v41, %v148_v43 }
 0x11b   :  { %312 = vmatmul.mubr.f32.vlgmr.msra.gmra.mrb[0].mxu1 %v149_v44 }
 0x1ee   :  { %v237_v46 = vpop.f32.mrb[0].mxu1 }
 0x1ef   :  { %v238_v47 = vadd.f32 %v261_v45, %v237_v46  ;;  %v313_v48 = vpop.f32.mrb[1].mxu1 }
 0x1f1   :  { %v241_v49 = vadd.f32 %v238_v47, %v138_v42 }
 0x1f3   :  { %242 = vst [vmem:[#allocation8] sm:$0xff] %v241_v49 }
 0x1f4   :  { %434 = shalt.err (!%p431_p0)
}
 0x1f5   :  { %s435_s9 = scalar_lea.hbm %s547_s4, 128 }
 0x1f6   :  { %p436_p1 = scmp.ne.s32.totalorder %s547_s4, %s435_s9  ;;  %p439_p2 = scmp.lt.u32.totalorder %s435_s9, %s547_s4 }
 0x1f8   :  { %p441_p3 = pnand %p439_p2, %p436_p1 }
 0x1fa   :  { %444 = shalt.err (!%p441_p3)
}
 0x1fb   :  { %252 = dma.vmem_to_hbm [thread:$0]  %s250_s5, 128, %s547_s4, [#allocation4]  }
 0x1fc   :  { %449 = dma.done.wait [#allocation4], 128  }
 0x1fd   :  { %450 = vsyncadd [#allocation4], 4294967168 }
 0x1fe   :  { %256 = vsyncpa [#allocation3], 1 }
 0x1ff   :  { %257 = vsyncpa [#allocation6], 1 }
 0x200   :  { %258 = vsyncpa [#allocation4], 1 }

</bundles_post_ra>
